<compile_context>
chip_gen: v6e
topology: v6e:2x2x1
jax: 0.10.0
libtpu: 0.0.40
codegen_flags: <defaults>
</compile_context>

<pallas_src>
import jax
import jax.numpy as jnp
from jax.experimental import pallas as pl
from jax.experimental.pallas import tpu as pltpu

LN_EPS = 1e-5


# ---------------------------------------------------------------------------
# Stage 1: fused token-row gather + positional add + LayerNorm -> bf16
# ---------------------------------------------------------------------------
def embed_ln_kernel(idx_ref, pos_ref, gamma_ref, beta_ref, tok_hbm,
                    hn_ref, gbuf, sems):
    # idx_ref:   (M,)      int32  flat token ids (SMEM, scalar-prefetched)
    # pos_ref:   (tm_e, D) f32    positional embeddings for this token tile
    # gamma_ref: (1, D)    f32    LayerNorm scale
    # beta_ref:  (1, D)    f32    LayerNorm shift
    # tok_hbm:   (V, D)    f32    embedding table, left in HBM (pl.ANY)
    # hn_ref:    (tm_e, D) bf16   normalized activations (output)
    # gbuf:      (tm_e, D) f32    VMEM gather landing buffer (scratch)
    # sems:      (tm_e,)   DMA    one semaphore per gathered row
    i = pl.program_id(0)
    tm = gbuf.shape[0]
    base = i * tm

    # Row gather: issue all per-row HBM->VMEM DMAs, then wait on all of them.
    @pl.loop(0, tm)
    def _issue(r):
        row = idx_ref[base + r]
        pltpu.make_async_copy(tok_hbm.at[row], gbuf.at[r], sems.at[r]).start()

    @pl.loop(0, tm)
    def _wait(r):
        pltpu.make_async_copy(tok_hbm.at[0], gbuf.at[r], sems.at[r]).wait()

    # Dropout is identity at inference; DummyTransformerBlocks are identity.
    # TODO(synk): training-mode dropout (pltpu.prng_seed / stateful_bernoulli)
    # not implemented.
    h = gbuf[...] + pos_ref[...]
    # Two-pass LayerNorm in f32 (cancellation-safe vs E[x^2] - E[x]^2).
    mu = jnp.mean(h, axis=-1, keepdims=True)
    xc = h - mu
    var = jnp.mean(xc * xc, axis=-1, keepdims=True)
    hn = xc * jax.lax.rsqrt(var + LN_EPS) * gamma_ref[...] + beta_ref[...]
    hn_ref[...] = hn.astype(hn_ref.dtype)


# ---------------------------------------------------------------------------
# Stage 2: vocab head  logits = hn @ W   (bf16 x bf16 -> f32 acc -> bf16/f32)
# ---------------------------------------------------------------------------
def head_matmul_kernel(hn_ref, w_ref, o_ref):
    # hn_ref: (tm, D)  bf16       normalized activations for this token tile
    # w_ref:  (D, tn)  bf16       head-weight slice (resident across token tiles)
    # o_ref:  (tm, tn) bf16/f32   logits tile
    o_ref[...] = jnp.dot(hn_ref[...], w_ref[...],
                         preferred_element_type=jnp.float32).astype(o_ref.dtype)


# ---------------------------------------------------------------------------
# Host-side helpers
# ---------------------------------------------------------------------------
def _aligned_divisor(dim, preferred, align):
    """Largest multiple of `align` that divides `dim` and is <= preferred, else None."""
    best = None
    t = align
    while t <= min(preferred, dim):
        if dim % t == 0:
            best = t
        t += align
    return best


def _vmem_budget_bytes():
    """~80% of this generation's physical VMEM (leave Mosaic scratch headroom)."""
    cap = 64 * 1024 * 1024                       # conservative fallback (v7x-sized)
    try:
        cap = int(pltpu.get_tpu_info().vmem_capacity_bytes)
    except Exception:
        pass
    return max(int(cap * 0.8), 16 * 1024 * 1024)


def dummy_gpt_forward(in_idx, params, *, tm_pref=256, tn_pref=2048,
                      logits_dtype=jnp.bfloat16):
    """in_idx: (B, T) int32 token ids -> logits (B, T, vocab_size)."""
    tok_table = params["tok_emb"]        # (V, D) f32
    pos_emb = params["pos_emb"]          # (1, context_size, D) f32
    gamma = params["ln_gamma"].reshape(1, -1)
    beta = params["ln_beta"].reshape(1, -1)
    w_dv = params["out_head"]            # (D, V) bf16 (pre-transposed vs PyTorch (V, D))

    B, T = in_idx.shape
    _, D = tok_table.shape
    D_w, V = w_dv.shape
    assert D_w == D
    M = B * T
    idx_flat = in_idx.reshape(-1).astype(jnp.int32)

    vmem_cap = _vmem_budget_bytes()
    out_bytes = jnp.dtype(logits_dtype).itemsize

    # -------- Stage 1: gather + pos + LayerNorm -> hn (M, D) bf16 -----------
    # Token tile dividing T so positional blocks come straight from the
    # index_map (no broadcast slab in HBM); prefer 16-row alignment for the
    # bf16 output packing.
    tm_e = _aligned_divisor(T, tm_pref, 16) or _aligned_divisor(T, tm_pref, 8)
    if tm_e is not None:
        pos_in = pos_emb[0, :T, :]                                    # (T, D)
        pos_period = T // tm_e
    else:
        # Awkward seq length: materialize the broadcast once in the wrapper.
        tm_e = (_aligned_divisor(M, tm_pref, 16)
                or _aligned_divisor(M, tm_pref, 8) or M)
        pos_in = jnp.broadcast_to(pos_emb[0, :T, :], (B, T, D)).reshape(M, D)
        pos_period = M // tm_e
    num_e = M // tm_e

    embed_cost = pl.CostEstimate(
        flops=10 * M * D,
        transcendentals=M,                                   # one rsqrt per row
        bytes_accessed=M * 4 + M * D * 4 + T * D * 4 + 2 * D * 4 + M * D * 2,
    )

    hn = pl.pallas_call(
        embed_ln_kernel,
        out_shape=jax.ShapeDtypeStruct((M, D), jnp.bfloat16),
        grid_spec=pltpu.PrefetchScalarGridSpec(
            num_scalar_prefetch=1,                           # idx_flat -> SMEM
            grid=(num_e,),
            in_specs=[
                pl.BlockSpec((tm_e, D), lambda i, idx: (i % pos_period, 0)),  # pos
                pl.BlockSpec((1, D), lambda i, idx: (0, 0)),                  # gamma
                pl.BlockSpec((1, D), lambda i, idx: (0, 0)),                  # beta
                pl.BlockSpec(memory_space=pl.ANY),                            # tok table (HBM)
            ],
            out_specs=pl.BlockSpec((tm_e, D), lambda i, idx: (i, 0)),
            scratch_shapes=[
                pltpu.VMEM((tm_e, D), jnp.float32),
                pltpu.SemaphoreType.DMA((tm_e,)),
            ],
        ),
        compiler_params=pltpu.CompilerParams(
            dimension_semantics=("arbitrary",),
        ),
        cost_estimate=embed_cost,
    )(idx_flat, pos_in, gamma, beta, tok_table)

    # -------- Stage 2: logits = hn @ W ---------------------------------------
    # Grow tiles as large as this generation's VMEM allows; shrink if needed.
    tm_p, tn_p = tm_pref, tn_pref
    while True:
        tm = _aligned_divisor(M, tm_p, 16) or _aligned_divisor(M, tm_p, 8) or M
        tn = _aligned_divisor(V, tn_p, 128) or V
        working = (2 * tm * D * 2                 # hn tiles (bf16, double-buffered)
                   + 2 * D * tn * 2               # W tiles (bf16, double-buffered)
                   + 2 * tm * tn * out_bytes)     # logits tiles
        if working <= vmem_cap or (tm_p <= 16 and tn_p <= 256):
            break
        if tn_p > 256:
            tn_p //= 2
        else:
            tm_p //= 2
    num_m = M // tm
    num_v = V // tn
    vmem_limit = min(max(int(working * 1.25), 16 * 1024 * 1024), vmem_cap)

    head_cost = pl.CostEstimate(
        flops=2 * M * D * V,
        transcendentals=0,
        bytes_accessed=num_v * M * D * 2 + D * V * 2 + M * V * out_bytes,
    )

    # TODO(synk): for very large D add a K-axis grid with an f32 accumulator
    # and/or pipeline_mode=pl.Buffered(3) on the W stream so the W DMA at
    # vocab-tile boundaries stays hidden.
    logits_flat = pl.pallas_call(
        head_matmul_kernel,
        out_shape=jax.ShapeDtypeStruct((M, V), logits_dtype),
        grid_spec=pltpu.PrefetchScalarGridSpec(
            num_scalar_prefetch=0,
            # Vocab axis OUTER, token axis INNER: the W tile's index_map
            # ignores the inner axis, so it stays resident across token tiles.
            grid=(num_v, num_m),
            in_specs=[
                pl.BlockSpec((tm, D), lambda j, i: (i, 0)),      # hn (bf16)
                pl.BlockSpec((D, tn), lambda j, i: (0, j)),      # W  (resident)
            ],
            out_specs=pl.BlockSpec((tm, tn), lambda j, i: (i, j)),
        ),
        compiler_params=pltpu.CompilerParams(
            # Megacore parts split the vocab (outer) axis, so each core's W
            # slice is streamed from HBM exactly once.
            dimension_semantics=("parallel", "arbitrary"),
            vmem_limit_bytes=vmem_limit,
        ),
        cost_estimate=head_cost,
    )(hn, w_dv)

    return logits_flat.reshape(B, T, V)


def init_params(key, cfg):
    """Deterministic parameter init matching DummyGPT.__init__ shapes."""
    k_tok, k_pos, k_out = jax.random.split(key, 3)
    V, D, C = cfg["vocab_size"], cfg["emb_dim"], cfg["context_size"]
    return {
        # nn.Embedding: N(0, 1)
        "tok_emb": jax.random.normal(k_tok, (V, D), dtype=jnp.float32),
        # positional embedding table (C, D), kept as (1, C, D)
        "pos_emb": jax.random.normal(k_pos, (1, C, D), dtype=jnp.float32),
        # nn.LayerNorm: gamma=1, beta=0
        "ln_gamma": jnp.ones((D,), dtype=jnp.float32),
        "ln_beta": jnp.zeros((D,), dtype=jnp.float32),
        # nn.Linear(D, V, bias=False).weight is (V, D) in PyTorch; stored
        # pre-transposed as (D, V) and in bf16 so the kernel streams half the
        # bytes and never pays a runtime transpose.
        "out_head": (jax.random.normal(k_out, (D, V), dtype=jnp.float32) * 0.02
                     ).astype(jnp.bfloat16),
    }


if __name__ == "__main__":
    cfg = {
        "vocab_size": 2048,
        "emb_dim": 128,       # lane-aligned (multiple of 128)
        "context_size": 32,
        "dropout": 0.1,       # identity at inference
        "n_layers": 2,        # DummyTransformerBlock is identity -> no compute
    }

    key = jax.random.PRNGKey(0)
    k_params, k_idx = jax.random.split(key)
    params = init_params(k_params, cfg)

    B, T = 2, 16
    in_idx = jax.random.randint(k_idx, (B, T), 0, cfg["vocab_size"], dtype=jnp.int32)

    # Default (production-preferred) tiles.
    logits = dummy_gpt_forward(in_idx, params)
    jax.block_until_ready(logits)

    # Also exercise the multi-tile path (several vocab tiles + token tiles).
    logits_tiled = dummy_gpt_forward(in_idx, params, tm_pref=16, tn_pref=512)
    jax.block_until_ready(logits_tiled)

    # Pure-JAX reference with the same precision policy (two-pass f32
    # LayerNorm, bf16 MXU operands, f32 accumulation, bf16 output).
    tok = jnp.take(params["tok_emb"], in_idx, axis=0)                 # (B, T, D)
    x = tok + params["pos_emb"][:, :T, :]
    mu = jnp.mean(x, axis=-1, keepdims=True)
    xc = x - mu
    var = jnp.mean(xc * xc, axis=-1, keepdims=True)
    xn = xc * jax.lax.rsqrt(var + LN_EPS) * params["ln_gamma"] + params["ln_beta"]
    hn_bf = xn.astype(jnp.bfloat16).astype(jnp.float32)
    ref = jnp.einsum("btd,dv->btv", hn_bf, params["out_head"].astype(jnp.float32))
    ref = ref.astype(jnp.bfloat16).astype(jnp.float32)

    assert logits.shape == (B, T, cfg["vocab_size"])
    assert logits.dtype == jnp.bfloat16
    assert jnp.allclose(logits.astype(jnp.float32), ref, atol=1e-2, rtol=1e-2)
    assert jnp.allclose(logits_tiled.astype(jnp.float32), ref, atol=1e-2, rtol=1e-2)

    print("KERNEL_OK")
</pallas_src>

<mosaic_0001>
module attributes {stable_mosaic.version = 11 : i64} {
  func.func @embed_ln_kernel(%arg0: i32, %arg1: memref<32xi32, #tpu.memory_space<smem>>, %arg2: memref<16x128xf32, #tpu.memory_space<vmem>>, %arg3: memref<1x128xf32, #tpu.memory_space<vmem>>, %arg4: memref<1x128xf32, #tpu.memory_space<vmem>>, %arg5: memref<2048x128xf32, #tpu.memory_space<any>>, %arg6: memref<16x128xbf16, #tpu.memory_space<vmem>>, %arg7: memref<16x128xf32, #tpu.memory_space<vmem>>, %arg8: memref<16x!tpu.dma_semaphore, #tpu.memory_space<semaphore_mem>>) attributes {dimension_semantics = [#tpu.dimension_semantics<arbitrary>], iteration_bounds = array<i64: 2>, scalar_prefetch = 1 : i64, scratch_operands = 2 : i64, tpu.core_type = #tpu.core_type<tc>, window_params = [{transform_indices = @transform_0, window_bounds = array<i64: 16, 128>}, {pipeline_mode = #tpu.pipeline_mode<synchronous>, transform_indices = @transform_1, window_bounds = array<i64: 1, 128>}, {pipeline_mode = #tpu.pipeline_mode<synchronous>, transform_indices = @transform_2, window_bounds = array<i64: 1, 128>}, {}, {transform_indices = @transform_4, window_bounds = array<i64: 16, 128>}]} {
    %c16_i32 = arith.constant 16 : i32
    %0 = arith.muli %arg0, %c16_i32 : i32
    %c0_i32 = arith.constant 0 : i32
    %c16_i32_0 = arith.constant 16 : i32
    %1 = arith.addi %c0_i32, %c16_i32_0 : i32
    %c1_i32 = arith.constant 1 : i32
    scf.for %arg9 = %c0_i32 to %1 step %c1_i32  : i32 {
      %c1_i32_19 = arith.constant 1 : i32
      %30 = arith.muli %arg9, %c1_i32_19 : i32
      %c0_i32_20 = arith.constant 0 : i32
      %31 = arith.addi %c0_i32_20, %30 : i32
      %32 = arith.addi %0, %31 : i32
      %33 = arith.index_cast %32 : i32 to index
      %34 = memref.load %arg1[%33] : memref<32xi32, #tpu.memory_space<smem>>
      %c0_i32_21 = arith.constant 0 : i32
      %35 = tpu.memref_slice %arg5[%34, %c0_i32_21] : memref<2048x128xf32, #tpu.memory_space<any>> -> memref<1x128xf32, #tpu.memory_space<any>>
      %36 = tpu.memref_squeeze %35 : memref<1x128xf32, #tpu.memory_space<any>> -> memref<128xf32, #tpu.memory_space<any>>
      %c0_i32_22 = arith.constant 0 : i32
      %37 = tpu.memref_slice %arg7[%31, %c0_i32_22] : memref<16x128xf32, #tpu.memory_space<vmem>> -> memref<1x128xf32, #tpu.memory_space<vmem>>
      %38 = tpu.memref_squeeze %37 : memref<1x128xf32, #tpu.memory_space<vmem>> -> memref<128xf32, #tpu.memory_space<vmem>>
      %39 = tpu.memref_slice %arg8[%31] : memref<16x!tpu.dma_semaphore, #tpu.memory_space<semaphore_mem>> -> memref<1x!tpu.dma_semaphore, #tpu.memory_space<semaphore_mem>>
      %40 = tpu.memref_squeeze %39 : memref<1x!tpu.dma_semaphore, #tpu.memory_space<semaphore_mem>> -> memref<!tpu.dma_semaphore, #tpu.memory_space<semaphore_mem>>
      tpu.enqueue_dma source(%36 : memref<128xf32, #tpu.memory_space<any>>) target(%38 : memref<128xf32, #tpu.memory_space<vmem>>) target_semaphore(%40 : memref<!tpu.dma_semaphore, #tpu.memory_space<semaphore_mem>>)
    }
    %c16_i32_1 = arith.constant 16 : i32
    %c0_i32_2 = arith.constant 0 : i32
    %c16_i32_3 = arith.constant 16 : i32
    %2 = arith.addi %c0_i32_2, %c16_i32_3 : i32
    %c1_i32_4 = arith.constant 1 : i32
    scf.for %arg9 = %c0_i32_2 to %2 step %c1_i32_4  : i32 {
      %c1_i32_19 = arith.constant 1 : i32
      %30 = arith.muli %arg9, %c1_i32_19 : i32
      %c0_i32_20 = arith.constant 0 : i32
      %31 = arith.addi %c0_i32_20, %30 : i32
      %c0_i32_21 = arith.constant 0 : i32
      %c0_i32_22 = arith.constant 0 : i32
      %32 = tpu.memref_slice %arg5[%c0_i32_21, %c0_i32_22] : memref<2048x128xf32, #tpu.memory_space<any>> -> memref<1x128xf32, #tpu.memory_space<any>>
      %33 = tpu.memref_squeeze %32 : memref<1x128xf32, #tpu.memory_space<any>> -> memref<128xf32, #tpu.memory_space<any>>
      %c0_i32_23 = arith.constant 0 : i32
      %34 = tpu.memref_slice %arg7[%31, %c0_i32_23] : memref<16x128xf32, #tpu.memory_space<vmem>> -> memref<1x128xf32, #tpu.memory_space<vmem>>
      %35 = tpu.memref_squeeze %34 : memref<1x128xf32, #tpu.memory_space<vmem>> -> memref<128xf32, #tpu.memory_space<vmem>>
      %36 = tpu.memref_slice %arg8[%31] : memref<16x!tpu.dma_semaphore, #tpu.memory_space<semaphore_mem>> -> memref<1x!tpu.dma_semaphore, #tpu.memory_space<semaphore_mem>>
      %37 = tpu.memref_squeeze %36 : memref<1x!tpu.dma_semaphore, #tpu.memory_space<semaphore_mem>> -> memref<!tpu.dma_semaphore, #tpu.memory_space<semaphore_mem>>
      tpu.wait_dma2 semaphore(%37 : memref<!tpu.dma_semaphore, #tpu.memory_space<semaphore_mem>>) src(%33 : memref<128xf32, #tpu.memory_space<any>>) dst(%35 : memref<128xf32, #tpu.memory_space<vmem>>)
    }
    %c16_i32_5 = arith.constant 16 : i32
    %c0 = arith.constant 0 : index
    %c0_6 = arith.constant 0 : index
    %3 = vector.load %arg7[%c0, %c0_6] : memref<16x128xf32, #tpu.memory_space<vmem>>, vector<16x128xf32>
    %c0_7 = arith.constant 0 : index
    %c0_8 = arith.constant 0 : index
    %4 = vector.load %arg2[%c0_7, %c0_8] : memref<16x128xf32, #tpu.memory_space<vmem>>, vector<16x128xf32>
    %5 = arith.addf %3, %4 : vector<16x128xf32>
    %cst = arith.constant dense<0.000000e+00> : vector<16xf32>
    %6 = vector.multi_reduction <add>, %5, %cst [1] : vector<16x128xf32> to vector<16xf32>
    %7 = vector.shape_cast %6 : vector<16xf32> to vector<16x1xf32>
    %cst_9 = arith.constant 1.280000e+02 : f32
    %8 = vector.broadcast %cst_9 : f32 to vector<16x1xf32>
    %9 = arith.divf %7, %8 : vector<16x1xf32>
    %10 = vector.broadcast %9 : vector<16x1xf32> to vector<16x128xf32>
    %11 = arith.subf %5, %10 : vector<16x128xf32>
    %12 = arith.mulf %11, %11 : vector<16x128xf32>
    %cst_10 = arith.constant dense<0.000000e+00> : vector<16xf32>
    %13 = vector.multi_reduction <add>, %12, %cst_10 [1] : vector<16x128xf32> to vector<16xf32>
    %14 = vector.shape_cast %13 : vector<16xf32> to vector<16x1xf32>
    %cst_11 = arith.constant 1.280000e+02 : f32
    %15 = vector.broadcast %cst_11 : f32 to vector<16x1xf32>
    %16 = arith.divf %14, %15 : vector<16x1xf32>
    %cst_12 = arith.constant 9.99999974E-6 : f32
    %17 = vector.broadcast %cst_12 : f32 to vector<16x1xf32>
    %18 = arith.addf %16, %17 : vector<16x1xf32>
    %19 = math.rsqrt %18 : vector<16x1xf32>
    %20 = vector.broadcast %19 : vector<16x1xf32> to vector<16x128xf32>
    %21 = arith.mulf %11, %20 : vector<16x128xf32>
    %c0_13 = arith.constant 0 : index
    %c0_14 = arith.constant 0 : index
    %22 = vector.load %arg3[%c0_13, %c0_14] : memref<1x128xf32, #tpu.memory_space<vmem>>, vector<1x128xf32>
    %23 = vector.broadcast %22 : vector<1x128xf32> to vector<16x128xf32>
    %24 = arith.mulf %21, %23 : vector<16x128xf32>
    %c0_15 = arith.constant 0 : index
    %c0_16 = arith.constant 0 : index
    %25 = vector.load %arg4[%c0_15, %c0_16] : memref<1x128xf32, #tpu.memory_space<vmem>>, vector<1x128xf32>
    %26 = vector.broadcast %25 : vector<1x128xf32> to vector<16x128xf32>
    %27 = arith.addf %24, %26 : vector<16x128xf32>
    %28 = arith.truncf %27 : vector<16x128xf32> to vector<16x128xbf16>
    %c0_17 = arith.constant 0 : index
    %c0_18 = arith.constant 0 : index
    %29 = vector.load %arg6[%c0_17, %c0_18] : memref<16x128xbf16, #tpu.memory_space<vmem>>, vector<16x128xbf16>
    tpu.vector_store %arg6[%c0_17, %c0_18], %28 {strides = array<i32>} : memref<16x128xbf16, #tpu.memory_space<vmem>>, vector<16x128xbf16>,
    return
  }
  func.func @transform_0(%arg0: i32, %arg1: memref<32xi32, #tpu.memory_space<smem>>) -> (i32, i32) {
    %c1_i32 = arith.constant 1 : i32
    %c0_i32 = arith.constant 0 : i32
    %0 = arith.cmpi eq, %c1_i32, %c0_i32 : i32
    %c1_i32_0 = arith.constant 1 : i32
    %1 = arith.select %0, %c1_i32_0, %c1_i32 : i32
    %2 = arith.remsi %arg0, %1 : i32
    %c0_i32_1 = arith.constant 0 : i32
    %3 = arith.cmpi ne, %2, %c0_i32_1 : i32
    %c0_i32_2 = arith.constant 0 : i32
    %4 = arith.cmpi slt, %2, %c0_i32_2 : i32
    %c0_i32_3 = arith.constant 0 : i32
    %5 = arith.cmpi slt, %1, %c0_i32_3 : i32
    %6 = arith.xori %4, %5 : i1
    %7 = arith.andi %6, %3 : i1
    %8 = arith.addi %2, %1 : i32
    %9 = arith.select %7, %8, %2 : i32
    %c0_i32_4 = arith.constant 0 : i32
    %c0_i32_5 = arith.constant 0 : i32
    return %9, %c0_i32_4 : i32, i32
  }
  func.func @transform_1(%arg0: i32, %arg1: memref<32xi32, #tpu.memory_space<smem>>) -> (i32, i32) {
    %c0_i32 = arith.constant 0 : i32
    %c0_i32_0 = arith.constant 0 : i32
    %c0_i32_1 = arith.constant 0 : i32
    return %c0_i32, %c0_i32_0 : i32, i32
  }
  func.func @transform_2(%arg0: i32, %arg1: memref<32xi32, #tpu.memory_space<smem>>) -> (i32, i32) {
    %c0_i32 = arith.constant 0 : i32
    %c0_i32_0 = arith.constant 0 : i32
    %c0_i32_1 = arith.constant 0 : i32
    return %c0_i32, %c0_i32_0 : i32, i32
  }
  func.func @transform_4(%arg0: i32, %arg1: memref<32xi32, #tpu.memory_space<smem>>) -> (i32, i32) {
    %c0_i32 = arith.constant 0 : i32
    %c0_i32_0 = arith.constant 0 : i32
    return %arg0, %c0_i32 : i32, i32
  }
}

</mosaic_0001>

<bundles_post_ra>
// kernel: tpu_custom_call.1
= control target key start
LH: loop header
LB: loop body
LE: loop exit
PB: predicated region body
PF: predicated region fallthrough
CT: control target
= control target key end

     0   :  { %s721_s18 = smov [#allocation5]   ;;  %s917_s0 = inlined_call_operand.hbm [shape: s32[32], index: 0, kind: input, shape index: {}]   ;;  %s918_s1 = inlined_call_operand.hbm [shape: f32[16,128], index: 1, kind: input, shape index: {}]   ;;  %s919_s2 = inlined_call_operand.vmem [shape: f32[1,128], index: 2, kind: input, shape index: {}]   ;;  %s920_s3 = inlined_call_operand.vmem [shape: f32[1,128], index: 3, kind: input, shape index: {}]   ;;  %s921_s4 = inlined_call_operand.hbm [shape: f32[2048,128], index: 4, kind: input, shape index: {}]   ;;  %s922_s5 = inlined_call_operand.hbm [shape: bf16[32,128], index: 5, kind: output, shape index: {}]  }
   0x1   :  { %924 = sst [smem:[#allocation18_spill]] %s918_s1 }
   0x2   :  { %11 = dma.hbm_to_smem %s917_s0, 16, %s721_s18, [#allocation4] }
   0x3   :  { %685 = dma.done.wait [#allocation4], 16 }
   0x4   :  { %686 = vsyncadd [#allocation4], 4294967280 }
   0x5   :  { %13 = sfence }
   0x6   :  { %14 = vsyncpa [#allocation7], 0 }
   0x7   :  { %15 = vsyncpa [#allocation8], 0 }
   0x8   :  { %17 = vsyncpa [#allocation8 + $0x1], 0  ;;  %s762_s21 = smov 0   ;;  %s764_s22 = smov 0  }
   0x9   :  { %s766_s23 = smov 0   ;;  %s768_s24 = smov 0  }
   0xa LB: > { %s783_s0 = sadd.s32 4294967295, %s711_s24   ;;  %s463_s25 = sadd.s32 4294967294, %s711_s24   ;;  %s711_s24 = sphi %s768_s24, %s936_s24   ;;  %s707_s23 = sphi %s766_s23, %s935_s23   ;;  %s703_s22 = sphi %s764_s22, %s934_s22   ;;  %s699_s21 = sphi %s762_s21, %s933_s21  }
   0xb   : > { %s787_s26 = sadd.s32 1, %s711_s24   ;;  %s93_s27 = sadd.s32 1, %s707_s23 }
   0xc   : > { %s90_s28 = ssub.s32 %s711_s24, %s787_s26  ;;  %p103_p0 = scmp.ne.s32.totalorder %s707_s23, %s703_s22 }
   0xd   : > { %p91_p1 = scmp.eq.s32.totalorder %s90_s28, 0  ;;  %p104_p2 = scmp.eq.s32.totalorder %s783_s0, 1 }
   0xe   : > { %p109_p3 = scmp.ne.s32.totalorder %s703_s22, %s699_s21  ;;  %p110_p4 = scmp.eq.s32.totalorder %s463_s25, 1 }
   0xf   : > { %s798_s29 = scalar_select %p91_p1, %s707_s23, %s93_s27  }
  0x10   : > { %p800_p5 = por %p104_p2, %p103_p0  ;;  %p804_p6 = por %p110_p4, %p109_p3 }
  0x11   : > { %p464_p7 = scmp.ge.s32.totalorder %s711_s24, 1  ;;  %p117_p8 = scmp.lt.s32.totalorder %s711_s24, 3 }
  0x12   : > { %s926_s6 = scalar_select %p804_p6, 1, 0 }
  0x13   : > { %p518_p9 = scmp.eq.s32.totalorder %s783_s0, 0  ;;  %p811_p10 = pnand %p464_p7, %p117_p8 }
  0x14   : > { %s722_s8 = smov [#allocation6]  }
  0x15   : > { %s129_s9 = sshll.u32 %s722_s8, 4  ;;  %p510_p11 = pneg %p811_p10  ;;  %s130_s9 = int_to_ptr.vmem [resolvable:$true] %s129_s9 }
  0x16   : > { %s598_s10 = scalar_lea.vmem %s130_s9, 256  ;;  %p606_p3 = scmp.lt.s32.totalorder %s130_s9, %s130_s9 }
  0x17   : > { %p511_p12 = pnand %p518_p9, %p510_p11  ;;  %p599_p0 = scmp.ne.s32.totalorder %s130_s9, %s598_s10 }
  0x18   : > { %p607_p4 = scmp.lt.s32.totalorder %s598_s10, %s598_s10 }
  0x19   : > { %p589_p13 = pneg %p511_p12 }
  0x1a   : > { %p608_p6 = por %p607_p4, %p606_p3 }
  0x1b   : > { %p601_p1 = pnand %p599_p0, %p589_p13 }
  0x1d   : > { %p602_p2 = pneg %p601_p1 }
  0x1f   : > { %p609_p7 = pnand %p608_p6, %p602_p2 }
  0x21   : > { %612 = shalt.err (!%p609_p7)
}
  0x22   : > { %s723_s11 = smov 128   ;;  %s724_s12 = smov 8  }
  0x23   : > { %s928_s1 = sld [smem:[#allocation18_spill]] }
  0x25   : > { %151 = sbr.rel (%p811_p10) target bundleno = 414 (0x19e), region = 32 }
  0x29   : > { %513 = dma.hbm_to_vmem [thread:$0]  (!%p511_p12), %s928_s1, 256, %s130_s9, [#allocation7], %s723_s11, %s723_s11, %s724_s12  }
  0x2a   : > { %688 = dma.done.wait (%p518_p9), [#allocation7], 256  }
  0x2b   : > { %690 = vsyncadd (%p518_p9), [#allocation7], 4294967040  ;;  %s923_s15 = sand.u32 1, %s703_s22   ;;  %s469_s16 = sshll.u32 %s783_s0, 4 }
  0x2c   : > { %s832_s17 = sshll.u32 %s923_s15, 3  ;;  %s835_s19 = smov 0  }
  0x2d LB: >> { %s178_s20 = sadd.s32 %s715_s19, %s469_s16  ;;  %s182_s27 = scalar_lea.vmem [#allocation2], %s715_s19  ;;  %s715_s19 = sphi %s835_s19, %s177_s19  }
  0x2e   : >> { %s179_s25 = sld [smem:[#allocation5 + %s178_s20]]  ;;  %s191_s28 = sshll.u32 %s182_s27, 4  ;;  %s192_s28 = int_to_ptr.vmem [resolvable:$true] %s191_s28 }
  0x2f   : >> { %s183_s11 = scalar_lea.sflag [#allocation3], %s715_s19  ;;  %s615_s15 = scalar_lea.hbm %s921_s4, 32768 }
  0x34   : >> { %s470_s7 = sshll.u32 %s179_s25, 4 }
  0x35   : >> { %s181_s10 = scalar_lea.hbm %s921_s4, %s470_s7 }
  0x36   : >> { %s613_s12 = scalar_lea.hbm %s181_s10, 16  ;;  %p616_p8 = scmp.lt.s32.totalorder %s181_s10, %s921_s4 }
  0x37   : >> { %p614_p6 = scmp.ne.s32.totalorder %s181_s10, %s613_s12  ;;  %p617_p9 = scmp.lt.s32.totalorder %s615_s15, %s613_s12 }
  0x39   : >> { %p618_p10 = por %p617_p9, %p616_p8 }
  0x3b   : >> { %p619_p11 = pnand %p618_p10, %p614_p6 }
  0x3d   : >> { %622 = shalt.err (!%p619_p11)  }
  0x3e   : >> { %s623_s20 = scalar_lea.vmem %s192_s28, 16  ;;  %s725_s25 = smov [#allocation2]  }
  0x3f   : >> { %p624_p12 = scmp.ne.s32.totalorder %s192_s28, %s623_s20  ;;  %s625_s27 = sshll.u32 %s725_s25, 4  ;;  %s626_s27 = int_to_ptr.vmem [resolvable:$false] %s625_s27 }
  0x40   : >> { %s627_s7 = scalar_lea.vmem %s626_s27, 256  ;;  %p628_p13 = scmp.lt.s32.totalorder %s192_s28, %s626_s27 }
  0x41   : >> { %p629_p0 = scmp.lt.s32.totalorder %s627_s7, %s623_s20 }
  0x43   : >> { %p630_p1 = por %p629_p0, %p628_p13 }
  0x45   : >> { %p631_p2 = pnand %p630_p1, %p624_p12 }
  0x47   : >> { %634 = shalt.err (!%p631_p2)  }
  0x48   : >> { %194 = dma.hbm_to_vmem [thread:$0]  %s181_s10, 16, %s192_s28, %s183_s11 }
  0x49   : >> { %s177_s19 = sadd.s32 1, %s715_s19  }
  0x4a   : >> { %p174_p3 = scmp.ge.s32.totalorder %s177_s19, 16  }
  0x4b   : > { %s717_s1 = smov (%p174_p3), 0  }
  0x4c   : > { %176 = sbr.rel (!%p174_p3) target bundleno = 45 (0x2d), region = 106 }
  0x51 LB: >> { %s201_s15 = scalar_lea.sflag [#allocation3], %s719_s1  ;;  %s719_s1 = sphi %s717_s1, %s200_s1  }
  0x52   : >> { %691 = dma.done.wait %s201_s15, 16 }
  0x53   : >> { %692 = vsyncadd %s201_s15, 4294967280  ;;  %s200_s1 = sadd.s32 1, %s719_s1  }
  0x54   : >> { %p197_p4 = scmp.ge.s32.totalorder %s200_s1, 16  }
  0x55   : > { %v204_v0 = vld [vmem:[#allocation2] sm:$0xff] (%p197_p4)  ;;  %v206_v1 = vld [vmem:[#allocation6] sm:$0xff] (%p197_p4)  ;;  %v205_v2 = vld [vmem:[#allocation2 + $0x8] sm:$0xff] (%p197_p4)  ;;  %s498_s8 = sshll.u32 (%p197_p4), %s783_s0, 7  ;;  %s929_s9 = scalar_lea.vmem (%p197_p4), [#allocation9], %s832_s17 }
  0x56   : > { %199 = sbr.rel (!%p197_p4) target bundleno = 81 (0x51), region = 117  ;;  %v208_v3 = vadd.f32 (%p197_p4), %v206_v1, %v204_v0  ;;  %v207_v4 = vld [vmem:[#allocation6 + $0x8] sm:$0xff] (%p197_p4)  ;;  %v471_v22 = vld [vmem:[%s919_s2] ss:$0 sm:$0xff] (%p197_p4)  ;;  %s275_s10 = sshll.u32 (%p197_p4), %s929_s9, 4  ;;  %s871_s10 = int_to_ptr.vmem [resolvable:$true] %s275_s10 }
  0x57   : > { %v209_v5 = vadd.f32 (%p197_p4), %v207_v4, %v205_v2  ;;  %v472_v26 = vld [vmem:[%s920_s3] ss:$0 sm:$0xff] (%p197_p4)  ;;  %s869_s13 = scalar_lea.hbm (%p197_p4), %s922_s5, %s498_s8  ;;  %s930_s14 = smov (%p197_p4), %s929_s9 }
  0x58   : > { %210 = vadd.xlane.f32.xlu0 (%p197_p4), %v208_v3  ;;  %s931_s20 = sand.u32 (%p197_p4), 1, %s703_s22   ;;  %s635_s0 = scalar_lea.vmem (%p197_p4), %s871_s10, 128 }
  0x59   : > { %s877_s25 = scalar_lea.sflag (%p197_p4), [#allocation8], %s931_s20  ;;  %p636_p7 = scmp.ne.s32.totalorder (%p197_p4), %s871_s10, %s635_s0 }
  0x5a   : > { %s726_s27 = smov (%p197_p4), [#allocation9]  }
  0x5b   : > { %p637_p6 = pnand %p636_p7, %p800_p5  ;;  %s639_s7 = sshll.u32 %s726_s27, 4  ;;  %s640_s7 = int_to_ptr.vmem [resolvable:$false] %s639_s7 }
  0x5c   : > { %212 = vadd.xlane.f32.xlu0 %v209_v5  ;;  %s641_s1 = scalar_lea.vmem %s640_s7, 256  ;;  %p642_p9 = scmp.lt.s32.totalorder %s871_s10, %s640_s7 }
  0x5d   : > { %p638_p8 = pneg %p637_p6  ;;  %p643_p10 = scmp.lt.s32.totalorder %s641_s1, %s635_s0 }
  0x5f   : > { %p644_p11 = por %p643_p10, %p642_p9 }
  0x61   : > { %p645_p12 = pnand %p644_p11, %p638_p8 }
  0xe1   : > { %v211_v6 = vpop.xlane.xlu0 %210 }
  0xe2   : > { %v215_v7 = vmul.f32 0.0078125, %v211_v6 }
  0xe4   : > { %v217_v8 = vsub.f32 %v208_v3, %v215_v7 }
  0xe5   : > { %v213_v9 = vpop.xlane.xlu0 %212 }
  0xe6   : > { %v216_v10 = vmul.f32 0.0078125, %v213_v9  ;;  %v219_v11 = vmul.f32 %v217_v8, %v217_v8 }
  0xe8   : > { %v218_v12 = vsub.f32 %v209_v5, %v216_v10  ;;  %221 = vadd.xlane.f32.xlu1 %v219_v11 }
  0xea   : > { %v220_v13 = vmul.f32 %v218_v12, %v218_v12 }
  0xec   : > { %223 = vadd.xlane.f32.xlu1 %v220_v13 }
 0x171   : > { %v222_v14 = vpop.xlane.xlu1 %221 }
 0x172   : > { %v225_v15 = vmul.f32 0.0078125, %v222_v14 }
 0x174   : > { %v227_v16 = vadd.f32 1e-05, %v225_v15 }
 0x175   : > { %v224_v17 = vpop.xlane.xlu1 %223 }
 0x176   : > { %575 = vrsqrt.f32 %v227_v16  ;;  %v226_v18 = vmul.f32 0.0078125, %v224_v17 }
 0x178   : > { %v228_v19 = vadd.f32 1e-05, %v226_v18 }
 0x17a   : > { %577 = vrsqrt.f32 %v228_v19 }
 0x183   : > { %v576_v20 = vpop.eup %575 }
 0x184   : > { %v231_v21 = vmul.f32 %v576_v20, %v217_v8 }
 0x186   : > { %v240_v25 = vmul.f32 %v471_v22, %v231_v21 }
 0x187   : > { %v578_v23 = vpop.eup %577 }
 0x188   : > { %v232_v24 = vmul.f32 %v578_v23, %v218_v12  ;;  %v249_v28 = vadd.f32 %v472_v26, %v240_v25 }
 0x18a   : > { %v241_v27 = vmul.f32 %v471_v22, %v232_v24 }
 0x18c   : > { %v250_v29 = vadd.f32 %v472_v26, %v241_v27 }
 0x18e   : > { %v502_v30 = vpack.c.bf16 %v250_v29, %v249_v28 }
 0x190   : > { %503 = vst [vmem:[%s930_s14] sm:$0xff] %v502_v30  }
 0x191   : > { %648 = shalt.err (!%p645_p12)
}
 0x192   : > { %s649_s17 = scalar_lea.hbm %s869_s13, 128  ;;  %s653_s18 = scalar_lea.hbm %s922_s5, 256 }
 0x193   : > { %p650_p13 = scmp.ne.s32.totalorder %s869_s13, %s649_s17  ;;  %p654_p2 = scmp.lt.s32.totalorder %s869_s13, %s922_s5 }
 0x194   : > { %p655_p3 = scmp.lt.s32.totalorder %s653_s18, %s649_s17 }
 0x195   : > { %p651_p0 = pnand %p650_p13, %p800_p5 }
 0x196   : > { %p656_p4 = por %p655_p3, %p654_p2 }
 0x197   : > { %p652_p1 = pneg %p651_p0 }
 0x199   : > { %p657_p7 = pnand %p656_p4, %p652_p1 }
 0x19b   : > { %660 = shalt.err (!%p657_p7)
}
 0x19c   : > { %s727_s8 = smov 64   ;;  %s728_s9 = smov 4  }
 0x19d   : > { %508 = dma.vmem_to_hbm [thread:$0]  (%p800_p5), %s871_s10, 128, %s869_s13, %s877_s25, %s727_s8, %s727_s8, %s728_s9  }
 0x19e PF: > { %p520_p6 = scmp.ge.s32.totalorder %s711_s24, 2  ;;  %s290_s11 = sand.u32 1, %s699_s21  }
 0x19f   : > { %p932_p8 = scmp.ne.s32.totalorder %s926_s6, 0  ;;  %s291_s12 = scalar_lea.sflag [#allocation8], %s290_s11 }
 0x1a1   : > { %p515_p9 = pnand %p520_p6, %p932_p8 }
 0x1a3   : > { %p516_p10 = pneg %p515_p9 }
 0x1a5   : > { %694 = dma.done.wait (%p516_p10), %s291_s12, 128  }
 0x1a6   : > { %696 = vsyncadd (%p516_p10), %s291_s12, 4294967168  ;;  %p20_p11 = scmp.ge.s32.totalorder %s787_s26, 4   ;;  %s933_s21 = smov %s703_s22 }
 0x1a7   : > { %s934_s22 = smov %s707_s23  ;;  %s935_s23 = smov %s798_s29 }
 0x1a8   : > { %s936_s24 = smov %s787_s26  ;;  %22 = sbr.rel (!%p20_p11) target bundleno = 10 (0xa), region = 128 }
 0x1ad   :  { %296 = vsyncpa [#allocation7], 1 }
 0x1ae   :  { %298 = vsyncpa [#allocation7 + $0x1], 1 }
 0x1af   :  { %299 = vsyncpa [#allocation8], 1 }
 0x1b0   :  { %301 = vsyncpa [#allocation8 + $0x1], 1 }
 0x1b1   :  { %302 = vsyncmov [#allocation3] }
 0x1b4   :  { %s303_s24 = vpop.sfrf %302 }
 0x1b5   :  { %p480_p5 = scmp.ne.s32.totalorder %s303_s24, 0 }
 0x1b7   :  { %307 = shalt.err (%p480_p5)  }
 0x1b8   :  { %309 = vsyncmov [#allocation3 + $0x1] }
 0x1bb   :  { %s310_s30 = vpop.sfrf %309 }
 0x1bc   :  { %p481_p12 = scmp.ne.s32.totalorder %s310_s30, 0 }
 0x1be   :  { %314 = shalt.err (%p481_p12)  }
 0x1bf   :  { %316 = vsyncmov [#allocation3 + $0x2] }
 0x1c2   :  { %s317_s6 = vpop.sfrf %316 }
 0x1c3   :  { %p482_p13 = scmp.ne.s32.totalorder %s317_s6, 0 }
 0x1c5   :  { %321 = shalt.err (%p482_p13)  }
 0x1c6   :  { %323 = vsyncmov [#allocation3 + $0x3] }
 0x1c9   :  { %s324_s29 = vpop.sfrf %323 }
 0x1ca   :  { %p483_p0 = scmp.ne.s32.totalorder %s324_s29, 0 }
 0x1cc   :  { %328 = shalt.err (%p483_p0)  }
 0x1cd   :  { %330 = vsyncmov [#allocation3 + $0x4] }
 0x1d0   :  { %s331_s2 = vpop.sfrf %330 }
 0x1d1   :  { %p484_p1 = scmp.ne.s32.totalorder %s331_s2, 0 }
 0x1d3   :  { %335 = shalt.err (%p484_p1)  }
 0x1d4   :  { %337 = vsyncmov [#allocation3 + $0x5] }
 0x1d7   :  { %s338_s3 = vpop.sfrf %337 }
 0x1d8   :  { %p485_p2 = scmp.ne.s32.totalorder %s338_s3, 0 }
 0x1da   :  { %342 = shalt.err (%p485_p2)  }
 0x1db   :  { %344 = vsyncmov [#allocation3 + $0x6] }
 0x1de   :  { %s345_s4 = vpop.sfrf %344 }
 0x1df   :  { %p486_p3 = scmp.ne.s32.totalorder %s345_s4, 0 }
 0x1e1   :  { %349 = shalt.err (%p486_p3)  }
 0x1e2   :  { %351 = vsyncmov [#allocation3 + $0x7] }
 0x1e5   :  { %s352_s5 = vpop.sfrf %351 }
 0x1e6   :  { %p487_p4 = scmp.ne.s32.totalorder %s352_s5, 0 }
 0x1e8   :  { %356 = shalt.err (%p487_p4)  }
 0x1e9   :  { %358 = vsyncmov [#allocation3 + $0x8] }
 0x1ec   :  { %s359_s21 = vpop.sfrf %358 }
 0x1ed   :  { %p488_p7 = scmp.ne.s32.totalorder %s359_s21, 0 }
 0x1ef   :  { %363 = shalt.err (%p488_p7)  }
 0x1f0   :  { %365 = vsyncmov [#allocation3 + $0x9] }
 0x1f3   :  { %s366_s22 = vpop.sfrf %365 }
 0x1f4   :  { %p489_p6 = scmp.ne.s32.totalorder %s366_s22, 0 }
 0x1f6   :  { %370 = shalt.err (%p489_p6)  }
 0x1f7   :  { %372 = vsyncmov [#allocation3 + $0xa] }
 0x1fa   :  { %s373_s23 = vpop.sfrf %372 }
 0x1fb   :  { %p490_p8 = scmp.ne.s32.totalorder %s373_s23, 0 }
 0x1fd   :  { %377 = shalt.err (%p490_p8)  }
 0x1fe   :  { %379 = vsyncmov [#allocation3 + $0xb] }
 0x201   :  { %s380_s26 = vpop.sfrf %379 }
 0x202   :  { %p491_p9 = scmp.ne.s32.totalorder %s380_s26, 0 }
 0x204   :  { %384 = shalt.err (%p491_p9)  }
 0x205   :  { %386 = vsyncmov [#allocation3 + $0xc] }
 0x208   :  { %s387_s10 = vpop.sfrf %386 }
 0x209   :  { %p492_p10 = scmp.ne.s32.totalorder %s387_s10, 0 }
 0x20b   :  { %391 = shalt.err (%p492_p10)  }
 0x20c   :  { %393 = vsyncmov [#allocation3 + $0xd] }
 0x20f   :  { %s394_s13 = vpop.sfrf %393 }
 0x210   :  { %p493_p11 = scmp.ne.s32.totalorder %s394_s13, 0 }
 0x212   :  { %398 = shalt.err (%p493_p11)  }
 0x213   :  { %400 = vsyncmov [#allocation3 + $0xe] }
 0x216   :  { %s401_s14 = vpop.sfrf %400 }
 0x217   :  { %p494_p5 = scmp.ne.s32.totalorder %s401_s14, 0 }
 0x219   :  { %405 = shalt.err (%p494_p5)  }
 0x21a   :  { %407 = vsyncmov [#allocation3 + $0xf] }
 0x21d   :  { %s408_s20 = vpop.sfrf %407 }
 0x21e   :  { %p495_p12 = scmp.ne.s32.totalorder %s408_s20, 0 }
 0x220   :  { %412 = shalt.err (%p495_p12)  }

</bundles_post_ra>
